<compile_context>
chip_gen: v5e
topology: v5e:2x2
jax: 0.10.0
libtpu: 0.0.40
codegen_flags: <defaults>
</compile_context>

<pallas_src>
import functools

import jax
import jax.numpy as jnp
from jax.experimental import pallas as pl
from jax.experimental.pallas import tpu as pltpu


def _ensemble_head_kernel(
    logits_ref,   # [Bt, 1]      f32   CE-roberta classification logits
    hidden_ref,   # [Bt, St, D]  f32/bf16  current stream's hidden-state tile
    mask_ref,     # [Bt, St]     int   current stream's attention-mask tile
    w_ref,        # SMEM (3,)    f32   linear_last weight
    b_ref,        # SMEM (1,)    f32   linear_last bias
    out_ref,      # [Bt, 1]      f32   prediction
    pooled_acc,   # VMEM scratch (4, Bt, D) f32  per-stream masked sums
    cnt_acc,      # VMEM scratch (4, Bt, 1) f32  per-stream token counts
):
    s = pl.program_id(1)          # stream index: 0=st_0, 1=st_1, 2=gist_0, 3=gist_1
    j = pl.program_id(2)          # seq-tile index (reduction axis)

    h = hidden_ref[...].astype(jnp.float32)       # [Bt, St, D] (upcast bf16 -> f32)
    m = mask_ref[...].astype(jnp.float32)         # [Bt, St]

    # Partial masked sum over this sequence tile.
    # NOTE: could be pushed onto the MXU via a batched einsum; kept on the VPU as
    # the kernel is HBM-bandwidth bound and this formulation lowers robustly.
    partial = jnp.sum(h * m[:, :, None], axis=1)          # [Bt, D]
    pcount = jnp.sum(m, axis=1, keepdims=True)            # [Bt, 1]

    @pl.when(j == 0)
    def _init():
        pooled_acc[s] = jnp.zeros_like(partial)
        cnt_acc[s] = jnp.zeros_like(pcount)

    pooled_acc[s] += partial
    cnt_acc[s] += pcount

    last_stream = s == pl.num_programs(1) - 1
    last_seq = j == pl.num_programs(2) - 1

    @pl.when(jnp.logical_and(last_stream, last_seq))
    def _finalize():
        eps = jnp.float32(1e-8)

        def pooled(k):
            # sum(hidden * mask) / sum(mask)   (average_pool; counts==0 -> inf/nan,
            # same as the PyTorch reference)
            return pooled_acc[k] * pl.reciprocal(cnt_acc[k], approx=False)

        def cos_sim(a, b2):
            # torch.nn.CosineSimilarity(dim=1, eps=1e-8)
            dot = jnp.sum(a * b2, axis=-1, keepdims=True)            # [Bt, 1]
            na = jnp.sqrt(jnp.sum(a * a, axis=-1, keepdims=True))
            nb = jnp.sqrt(jnp.sum(b2 * b2, axis=-1, keepdims=True))
            denom = jnp.maximum(na, eps) * jnp.maximum(nb, eps)
            return dot * pl.reciprocal(denom, approx=False)

        st0, st1 = pooled(0), pooled(1)
        g0, g1 = pooled(2), pooled(3)

        sts_sim = jax.nn.sigmoid(logits_ref[...].astype(jnp.float32))   # [Bt, 1]
        st_sim = cos_sim(st0, st1)                                      # [Bt, 1]
        gist_sim = cos_sim(g0, g1)                                      # [Bt, 1]

        # prediction = linear_last(relu(stack([sts, st, gist], dim=1)))
        r0 = jnp.maximum(sts_sim, 0.0)
        r1 = jnp.maximum(st_sim, 0.0)
        r2 = jnp.maximum(gist_sim, 0.0)
        out_ref[...] = (
            r0 * w_ref[0] + r1 * w_ref[1] + r2 * w_ref[2] + b_ref[0]
        ).astype(out_ref.dtype)


def hybrid_ensemble_head(
    logits, st_h0, st_m0, st_h1, st_m1, g_h0, g_m0, g_h1, g_m1, w, b,
    *, block_b=None, block_s=None, vmem_limit_bytes=None,
):
    B, S, D = st_h0.shape

    # One stacked stream tensor -> one DMA stream; only one stream tile resident
    # per grid step (stream axis is a grid axis).
    hidden = jnp.stack([st_h0, st_h1, g_h0, g_h1], axis=0)    # [4, B, S, D]
    masks = jnp.stack([st_m0, st_m1, g_m0, g_m1], axis=0)     # [4, B, S]

    # Tile selection honoring the (8, 128) block constraints:
    #   mask block (Bt, St): Bt multiple of 8 or == B; St multiple of 128 or == S.
    if block_b is None:
        block_b = 8 if B % 8 == 0 else B
    if block_s is None:
        block_s = next((c for c in (512, 256, 128) if S % c == 0), S)
    Bt, St = block_b, block_s
    assert B % Bt == 0 and S % St == 0

    grid = (B // Bt, 4, S // St)   # (batch tiles, streams, seq tiles)
    smem = pltpu.MemorySpace.SMEM

    grid_spec = pltpu.PrefetchScalarGridSpec(
        num_scalar_prefetch=0,
        grid=grid,
        in_specs=[
            # logits: fetched once per batch tile (constant over s, j)
            pl.BlockSpec((Bt, 1), lambda i, s, j: (i, 0)),
            # hidden states: [4,B,S,D] -> (Bt, St, D) tile of stream s
            pl.BlockSpec((None, Bt, St, D), lambda i, s, j: (s, i, j, 0)),
            # masks: [4,B,S] -> (Bt, St) tile of stream s
            pl.BlockSpec((None, Bt, St), lambda i, s, j: (s, i, j)),
            # linear_last parameters live in SMEM
            pl.BlockSpec(memory_space=smem),   # w (3,)
            pl.BlockSpec(memory_space=smem),   # b (1,)
        ],
        # Output block depends only on the batch axis -> resident across the
        # stream/seq reduction axes, written back to HBM once per batch tile.
        out_specs=pl.BlockSpec((Bt, 1), lambda i, s, j: (i, 0)),
        scratch_shapes=[
            pltpu.VMEM((4, Bt, D), jnp.float32),   # per-stream pooled sums
            pltpu.VMEM((4, Bt, 1), jnp.float32),   # per-stream token counts
        ],
    )

    return pl.pallas_call(
        _ensemble_head_kernel,
        out_shape=jax.ShapeDtypeStruct((B, 1), jnp.float32),
        grid_spec=grid_spec,
        compiler_params=pltpu.CompilerParams(
            # batch tiles are independent (megacore on v7x); stream & seq axes
            # are reductions into per-batch-tile accumulators/output.
            dimension_semantics=("parallel", "arbitrary", "arbitrary"),
            vmem_limit_bytes=vmem_limit_bytes,
        ),
    )(logits, hidden, masks, w, b)


def _reference(logits, st_h0, st_m0, st_h1, st_m1, g_h0, g_m0, g_h1, g_m1, w, b):
    def avg_pool(h, m):
        m = m.astype(jnp.float32)
        return jnp.sum(h.astype(jnp.float32) * m[:, :, None], axis=1) / jnp.sum(
            m, axis=1, keepdims=True)

    def cos(a, b2):
        eps = 1e-8
        na = jnp.maximum(jnp.linalg.norm(a, axis=-1), eps)
        nb = jnp.maximum(jnp.linalg.norm(b2, axis=-1), eps)
        return jnp.sum(a * b2, axis=-1) / (na * nb)

    sts = jax.nn.sigmoid(logits).reshape(-1)
    st = cos(avg_pool(st_h0, st_m0), avg_pool(st_h1, st_m1))
    gi = cos(avg_pool(g_h0, g_m0), avg_pool(g_h1, g_m1))
    feats = jax.nn.relu(jnp.stack([sts, st, gi], axis=1))
    return feats @ w.reshape(3, 1) + b


if __name__ == "__main__":
    B, S, D = 2, 8, 32
    key = jax.random.PRNGKey(0)
    ks = jax.random.split(key, 8)

    logits = jax.random.normal(ks[0], (B, 1), jnp.float32)
    st_h0 = jax.random.normal(ks[1], (B, S, D), jnp.float32)
    st_h1 = jax.random.normal(ks[2], (B, S, D), jnp.float32)
    g_h0 = jax.random.normal(ks[3], (B, S, D), jnp.float32)
    g_h1 = jax.random.normal(ks[4], (B, S, D), jnp.float32)

    # attention masks: first row fully valid, second row has 3 padded tokens
    lens = jnp.array([S, S - 3], jnp.int32)
    mask = (jnp.arange(S)[None, :] < lens[:, None]).astype(jnp.int32)

    # deterministic linear_last (3 -> 1) parameters
    w = jax.random.normal(ks[5], (3,), jnp.float32) * 0.5
    b = jax.random.normal(ks[6], (1,), jnp.float32) * 0.1

    # --- f32 hidden states: exact-match check against the pure-JAX reference ---
    out = hybrid_ensemble_head(
        logits, st_h0, mask, st_h1, mask, g_h0, mask, g_h1, mask, w, b
    )
    out = jax.block_until_ready(out)
    ref = _reference(
        logits, st_h0, mask, st_h1, mask, g_h0, mask, g_h1, mask, w, b
    )
    assert out.shape == (B, 1)
    assert jnp.allclose(out, ref, atol=1e-5, rtol=1e-5), (out, ref)

    # --- bf16 hidden states (recommended for real shapes: halves HBM bytes of
    #     the dominant [B,S,D] tensors); kernel upcasts & accumulates in f32 ---
    bf = lambda x: x.astype(jnp.bfloat16)
    out_bf = hybrid_ensemble_head(
        logits, bf(st_h0), mask, bf(st_h1), mask, bf(g_h0), mask, bf(g_h1), mask, w, b
    )
    out_bf = jax.block_until_ready(out_bf)
    ref_bf = _reference(
        logits,
        bf(st_h0).astype(jnp.float32), mask,
        bf(st_h1).astype(jnp.float32), mask,
        bf(g_h0).astype(jnp.float32), mask,
        bf(g_h1).astype(jnp.float32), mask,
        w, b,
    )
    assert jnp.allclose(out_bf, ref_bf, atol=1e-4, rtol=1e-4), (out_bf, ref_bf)

    print("KERNEL_OK")
</pallas_src>

<mosaic_0001>
module attributes {stable_mosaic.version = 11 : i64} {
  func.func @_ensemble_head_kernel(%arg0: i32, %arg1: i32, %arg2: i32, %arg3: memref<2x1xf32, #tpu.memory_space<vmem>>, %arg4: memref<1x2x8x32xf32, #tpu.memory_space<vmem>>, %arg5: memref<1x2x8xi32, #tpu.memory_space<vmem>>, %arg6: memref<3xf32, #tpu.memory_space<smem>>, %arg7: memref<1xf32, #tpu.memory_space<smem>>, %arg8: memref<2x1xf32, #tpu.memory_space<vmem>>, %arg9: memref<4x2x32xf32, #tpu.memory_space<vmem>>, %arg10: memref<4x2x1xf32, #tpu.memory_space<vmem>>) attributes {dimension_semantics = [#tpu.dimension_semantics<parallel>, #tpu.dimension_semantics<arbitrary>, #tpu.dimension_semantics<arbitrary>], iteration_bounds = array<i64: 1, 4, 1>, scalar_prefetch = 0 : i64, scratch_operands = 2 : i64, tpu.core_type = #tpu.core_type<tc>, window_params = [{transform_indices = @transform_0, window_bounds = array<i64: 2, 1>}, {transform_indices = @transform_1, window_bounds = array<i64: 1, 2, 8, 32>}, {transform_indices = @transform_2, window_bounds = array<i64: 1, 2, 8>}, {transform_indices = @transform_3, window_bounds = array<i64: 3>}, {transform_indices = @transform_4, window_bounds = array<i64: 1>}, {transform_indices = @transform_5, window_bounds = array<i64: 2, 1>}]} {
    %c0 = arith.constant 0 : index
    %c0_0 = arith.constant 0 : index
    %c0_1 = arith.constant 0 : index
    %c0_2 = arith.constant 0 : index
    %0 = vector.load %arg4[%c0, %c0_0, %c0_1, %c0_2] : memref<1x2x8x32xf32, #tpu.memory_space<vmem>>, vector<1x2x8x32xf32>
    %1 = vector.shape_cast %0 : vector<1x2x8x32xf32> to vector<2x8x32xf32>
    %c0_3 = arith.constant 0 : index
    %c0_4 = arith.constant 0 : index
    %c0_5 = arith.constant 0 : index
    %2 = vector.load %arg5[%c0_3, %c0_4, %c0_5] : memref<1x2x8xi32, #tpu.memory_space<vmem>>, vector<1x2x8xi32>
    %3 = vector.shape_cast %2 : vector<1x2x8xi32> to vector<2x8xi32>
    %4 = arith.sitofp %3 : vector<2x8xi32> to vector<2x8xf32>
    %5 = vector.shape_cast %4 : vector<2x8xf32> to vector<2x8x1xf32>
    %6 = vector.broadcast %5 : vector<2x8x1xf32> to vector<2x8x32xf32>
    %7 = arith.mulf %1, %6 : vector<2x8x32xf32>
    %cst = arith.constant dense<0.000000e+00> : vector<2x32xf32>
    %8 = vector.multi_reduction <add>, %7, %cst [1] : vector<2x8x32xf32> to vector<2x32xf32>
    %cst_6 = arith.constant dense<0.000000e+00> : vector<2xf32>
    %9 = vector.multi_reduction <add>, %4, %cst_6 [1] : vector<2x8xf32> to vector<2xf32>
    %10 = vector.shape_cast %9 : vector<2xf32> to vector<2x1xf32>
    %c0_i32 = arith.constant 0 : i32
    %11 = arith.cmpi eq, %arg2, %c0_i32 : i32
    %12 = arith.extui %11 : i1 to i32
    %c0_i32_7 = arith.constant 0 : i32
    %13 = arith.cmpi ne, %12, %c0_i32_7 : i32
    scf.if %13 {
      %cst_18 = arith.constant 0.000000e+00 : f32
      %35 = vector.broadcast %cst_18 : f32 to vector<2x32xf32>
      %36 = arith.index_cast %arg1 : i32 to index
      %c0_19 = arith.constant 0 : index
      %c0_20 = arith.constant 0 : index
      %37 = vector.load %arg9[%36, %c0_19, %c0_20] : memref<4x2x32xf32, #tpu.memory_space<vmem>>, vector<1x2x32xf32>
      %38 = vector.shape_cast %37 : vector<1x2x32xf32> to vector<2x32xf32>
      %39 = vector.shape_cast %35 : vector<2x32xf32> to vector<1x2x32xf32>
      tpu.vector_store %arg9[%36, %c0_19, %c0_20], %39 {strides = array<i32>} : memref<4x2x32xf32, #tpu.memory_space<vmem>>, vector<1x2x32xf32>,
      %cst_21 = arith.constant 0.000000e+00 : f32
      %40 = vector.broadcast %cst_21 : f32 to vector<2x1xf32>
      %41 = arith.index_cast %arg1 : i32 to index
      %c0_22 = arith.constant 0 : index
      %c0_23 = arith.constant 0 : index
      %42 = vector.load %arg10[%41, %c0_22, %c0_23] : memref<4x2x1xf32, #tpu.memory_space<vmem>>, vector<1x2x1xf32>
      %43 = vector.shape_cast %42 : vector<1x2x1xf32> to vector<2x1xf32>
      %44 = vector.shape_cast %40 : vector<2x1xf32> to vector<1x2x1xf32>
      tpu.vector_store %arg10[%41, %c0_22, %c0_23], %44 {strides = array<i32>} : memref<4x2x1xf32, #tpu.memory_space<vmem>>, vector<1x2x1xf32>,
    } else {
    }
    %14 = arith.index_cast %arg1 : i32 to index
    %c0_8 = arith.constant 0 : index
    %c0_9 = arith.constant 0 : index
    %15 = vector.load %arg9[%14, %c0_8, %c0_9] : memref<4x2x32xf32, #tpu.memory_space<vmem>>, vector<1x2x32xf32>
    %16 = vector.shape_cast %15 : vector<1x2x32xf32> to vector<2x32xf32>
    %17 = arith.addf %16, %8 : vector<2x32xf32>
    %18 = arith.index_cast %arg1 : i32 to index
    %c0_10 = arith.constant 0 : index
    %c0_11 = arith.constant 0 : index
    %19 = vector.load %arg9[%18, %c0_10, %c0_11] : memref<4x2x32xf32, #tpu.memory_space<vmem>>, vector<1x2x32xf32>
    %20 = vector.shape_cast %19 : vector<1x2x32xf32> to vector<2x32xf32>
    %21 = vector.shape_cast %17 : vector<2x32xf32> to vector<1x2x32xf32>
    tpu.vector_store %arg9[%18, %c0_10, %c0_11], %21 {strides = array<i32>} : memref<4x2x32xf32, #tpu.memory_space<vmem>>, vector<1x2x32xf32>,
    %22 = arith.index_cast %arg1 : i32 to index
    %c0_12 = arith.constant 0 : index
    %c0_13 = arith.constant 0 : index
    %23 = vector.load %arg10[%22, %c0_12, %c0_13] : memref<4x2x1xf32, #tpu.memory_space<vmem>>, vector<1x2x1xf32>
    %24 = vector.shape_cast %23 : vector<1x2x1xf32> to vector<2x1xf32>
    %25 = arith.addf %24, %10 : vector<2x1xf32>
    %26 = arith.index_cast %arg1 : i32 to index
    %c0_14 = arith.constant 0 : index
    %c0_15 = arith.constant 0 : index
    %27 = vector.load %arg10[%26, %c0_14, %c0_15] : memref<4x2x1xf32, #tpu.memory_space<vmem>>, vector<1x2x1xf32>
    %28 = vector.shape_cast %27 : vector<1x2x1xf32> to vector<2x1xf32>
    %29 = vector.shape_cast %25 : vector<2x1xf32> to vector<1x2x1xf32>
    tpu.vector_store %arg10[%26, %c0_14, %c0_15], %29 {strides = array<i32>} : memref<4x2x1xf32, #tpu.memory_space<vmem>>, vector<1x2x1xf32>,
    %c3_i32 = arith.constant 3 : i32
    %30 = arith.cmpi eq, %arg1, %c3_i32 : i32
    %c0_i32_16 = arith.constant 0 : i32
    %31 = arith.cmpi eq, %arg2, %c0_i32_16 : i32
    %32 = arith.andi %30, %31 : i1
    %33 = arith.extui %32 : i1 to i32
    %c0_i32_17 = arith.constant 0 : i32
    %34 = arith.cmpi ne, %33, %c0_i32_17 : i32
    scf.if %34 {
      %c0_18 = arith.constant 0 : index
      %c0_19 = arith.constant 0 : index
      %c0_20 = arith.constant 0 : index
      %35 = vector.load %arg9[%c0_18, %c0_19, %c0_20] : memref<4x2x32xf32, #tpu.memory_space<vmem>>, vector<1x2x32xf32>
      %36 = vector.shape_cast %35 : vector<1x2x32xf32> to vector<2x32xf32>
      %c0_21 = arith.constant 0 : index
      %c0_22 = arith.constant 0 : index
      %c0_23 = arith.constant 0 : index
      %37 = vector.load %arg10[%c0_21, %c0_22, %c0_23] : memref<4x2x1xf32, #tpu.memory_space<vmem>>, vector<1x2x1xf32>
      %38 = vector.shape_cast %37 : vector<1x2x1xf32> to vector<2x1xf32>
      %39 = tpu.reciprocal %38 : vector<2x1xf32> -> vector<2x1xf32>
      %40 = vector.broadcast %39 : vector<2x1xf32> to vector<2x32xf32>
      %41 = arith.mulf %36, %40 : vector<2x32xf32>
      %c1 = arith.constant 1 : index
      %c0_24 = arith.constant 0 : index
      %c0_25 = arith.constant 0 : index
      %42 = vector.load %arg9[%c1, %c0_24, %c0_25] : memref<4x2x32xf32, #tpu.memory_space<vmem>>, vector<1x2x32xf32>
      %43 = vector.shape_cast %42 : vector<1x2x32xf32> to vector<2x32xf32>
      %c1_26 = arith.constant 1 : index
      %c0_27 = arith.constant 0 : index
      %c0_28 = arith.constant 0 : index
      %44 = vector.load %arg10[%c1_26, %c0_27, %c0_28] : memref<4x2x1xf32, #tpu.memory_space<vmem>>, vector<1x2x1xf32>
      %45 = vector.shape_cast %44 : vector<1x2x1xf32> to vector<2x1xf32>
      %46 = tpu.reciprocal %45 : vector<2x1xf32> -> vector<2x1xf32>
      %47 = vector.broadcast %46 : vector<2x1xf32> to vector<2x32xf32>
      %48 = arith.mulf %43, %47 : vector<2x32xf32>
      %c2 = arith.constant 2 : index
      %c0_29 = arith.constant 0 : index
      %c0_30 = arith.constant 0 : index
      %49 = vector.load %arg9[%c2, %c0_29, %c0_30] : memref<4x2x32xf32, #tpu.memory_space<vmem>>, vector<1x2x32xf32>
      %50 = vector.shape_cast %49 : vector<1x2x32xf32> to vector<2x32xf32>
      %c2_31 = arith.constant 2 : index
      %c0_32 = arith.constant 0 : index
      %c0_33 = arith.constant 0 : index
      %51 = vector.load %arg10[%c2_31, %c0_32, %c0_33] : memref<4x2x1xf32, #tpu.memory_space<vmem>>, vector<1x2x1xf32>
      %52 = vector.shape_cast %51 : vector<1x2x1xf32> to vector<2x1xf32>
      %53 = tpu.reciprocal %52 : vector<2x1xf32> -> vector<2x1xf32>
      %54 = vector.broadcast %53 : vector<2x1xf32> to vector<2x32xf32>
      %55 = arith.mulf %50, %54 : vector<2x32xf32>
      %c3 = arith.constant 3 : index
      %c0_34 = arith.constant 0 : index
      %c0_35 = arith.constant 0 : index
      %56 = vector.load %arg9[%c3, %c0_34, %c0_35] : memref<4x2x32xf32, #tpu.memory_space<vmem>>, vector<1x2x32xf32>
      %57 = vector.shape_cast %56 : vector<1x2x32xf32> to vector<2x32xf32>
      %c3_36 = arith.constant 3 : index
      %c0_37 = arith.constant 0 : index
      %c0_38 = arith.constant 0 : index
      %58 = vector.load %arg10[%c3_36, %c0_37, %c0_38] : memref<4x2x1xf32, #tpu.memory_space<vmem>>, vector<1x2x1xf32>
      %59 = vector.shape_cast %58 : vector<1x2x1xf32> to vector<2x1xf32>
      %60 = tpu.reciprocal %59 : vector<2x1xf32> -> vector<2x1xf32>
      %61 = vector.broadcast %60 : vector<2x1xf32> to vector<2x32xf32>
      %62 = arith.mulf %57, %61 : vector<2x32xf32>
      %c0_39 = arith.constant 0 : index
      %c0_40 = arith.constant 0 : index
      %63 = vector.load %arg3[%c0_39, %c0_40] : memref<2x1xf32, #tpu.memory_space<vmem>>, vector<2x1xf32>
      %64 = arith.negf %63 : vector<2x1xf32>
      %65 = math.exp %64 : vector<2x1xf32>
      %cst_41 = arith.constant 1.000000e+00 : f32
      %66 = vector.broadcast %cst_41 : f32 to vector<2x1xf32>
      %67 = arith.addf %66, %65 : vector<2x1xf32>
      %68 = arith.divf %66, %67 : vector<2x1xf32>
      %69 = arith.mulf %41, %48 : vector<2x32xf32>
      %cst_42 = arith.constant dense<0.000000e+00> : vector<2xf32>
      %70 = vector.multi_reduction <add>, %69, %cst_42 [1] : vector<2x32xf32> to vector<2xf32>
      %71 = vector.shape_cast %70 : vector<2xf32> to vector<2x1xf32>
      %72 = arith.mulf %41, %41 : vector<2x32xf32>
      %cst_43 = arith.constant dense<0.000000e+00> : vector<2xf32>
      %73 = vector.multi_reduction <add>, %72, %cst_43 [1] : vector<2x32xf32> to vector<2xf32>
      %74 = vector.shape_cast %73 : vector<2xf32> to vector<2x1xf32>
      %75 = math.sqrt %74 : vector<2x1xf32>
      %76 = arith.mulf %48, %48 : vector<2x32xf32>
      %cst_44 = arith.constant dense<0.000000e+00> : vector<2xf32>
      %77 = vector.multi_reduction <add>, %76, %cst_44 [1] : vector<2x32xf32> to vector<2xf32>
      %78 = vector.shape_cast %77 : vector<2xf32> to vector<2x1xf32>
      %79 = math.sqrt %78 : vector<2x1xf32>
      %cst_45 = arith.constant 9.99999993E-9 : f32
      %80 = vector.broadcast %cst_45 : f32 to vector<2x1xf32>
      %81 = arith.maximumf %75, %80 : vector<2x1xf32>
      %cst_46 = arith.constant 9.99999993E-9 : f32
      %82 = vector.broadcast %cst_46 : f32 to vector<2x1xf32>
      %83 = arith.maximumf %79, %82 : vector<2x1xf32>
      %84 = arith.mulf %81, %83 : vector<2x1xf32>
      %85 = tpu.reciprocal %84 : vector<2x1xf32> -> vector<2x1xf32>
      %86 = arith.mulf %71, %85 : vector<2x1xf32>
      %87 = arith.mulf %55, %62 : vector<2x32xf32>
      %cst_47 = arith.constant dense<0.000000e+00> : vector<2xf32>
      %88 = vector.multi_reduction <add>, %87, %cst_47 [1] : vector<2x32xf32> to vector<2xf32>
      %89 = vector.shape_cast %88 : vector<2xf32> to vector<2x1xf32>
      %90 = arith.mulf %55, %55 : vector<2x32xf32>
      %cst_48 = arith.constant dense<0.000000e+00> : vector<2xf32>
      %91 = vector.multi_reduction <add>, %90, %cst_48 [1] : vector<2x32xf32> to vector<2xf32>
      %92 = vector.shape_cast %91 : vector<2xf32> to vector<2x1xf32>
      %93 = math.sqrt %92 : vector<2x1xf32>
      %94 = arith.mulf %62, %62 : vector<2x32xf32>
      %cst_49 = arith.constant dense<0.000000e+00> : vector<2xf32>
      %95 = vector.multi_reduction <add>, %94, %cst_49 [1] : vector<2x32xf32> to vector<2xf32>
      %96 = vector.shape_cast %95 : vector<2xf32> to vector<2x1xf32>
      %97 = math.sqrt %96 : vector<2x1xf32>
      %cst_50 = arith.constant 9.99999993E-9 : f32
      %98 = vector.broadcast %cst_50 : f32 to vector<2x1xf32>
      %99 = arith.maximumf %93, %98 : vector<2x1xf32>
      %cst_51 = arith.constant 9.99999993E-9 : f32
      %100 = vector.broadcast %cst_51 : f32 to vector<2x1xf32>
      %101 = arith.maximumf %97, %100 : vector<2x1xf32>
      %102 = arith.mulf %99, %101 : vector<2x1xf32>
      %103 = tpu.reciprocal %102 : vector<2x1xf32> -> vector<2x1xf32>
      %104 = arith.mulf %89, %103 : vector<2x1xf32>
      %cst_52 = arith.constant 0.000000e+00 : f32
      %105 = vector.broadcast %cst_52 : f32 to vector<2x1xf32>
      %106 = arith.maximumf %68, %105 : vector<2x1xf32>
      %cst_53 = arith.constant 0.000000e+00 : f32
      %107 = vector.broadcast %cst_53 : f32 to vector<2x1xf32>
      %108 = arith.maximumf %86, %107 : vector<2x1xf32>
      %cst_54 = arith.constant 0.000000e+00 : f32
      %109 = vector.broadcast %cst_54 : f32 to vector<2x1xf32>
      %110 = arith.maximumf %104, %109 : vector<2x1xf32>
      %c0_55 = arith.constant 0 : index
      %111 = memref.load %arg6[%c0_55] : memref<3xf32, #tpu.memory_space<smem>>
      %112 = vector.broadcast %111 : f32 to vector<2x1xf32>
      %113 = arith.mulf %106, %112 : vector<2x1xf32>
      %c1_56 = arith.constant 1 : index
      %114 = memref.load %arg6[%c1_56] : memref<3xf32, #tpu.memory_space<smem>>
      %115 = vector.broadcast %114 : f32 to vector<2x1xf32>
      %116 = arith.mulf %108, %115 : vector<2x1xf32>
      %117 = arith.addf %113, %116 : vector<2x1xf32>
      %c2_57 = arith.constant 2 : index
      %118 = memref.load %arg6[%c2_57] : memref<3xf32, #tpu.memory_space<smem>>
      %119 = vector.broadcast %118 : f32 to vector<2x1xf32>
      %120 = arith.mulf %110, %119 : vector<2x1xf32>
      %121 = arith.addf %117, %120 : vector<2x1xf32>
      %c0_58 = arith.constant 0 : index
      %122 = memref.load %arg7[%c0_58] : memref<1xf32, #tpu.memory_space<smem>>
      %123 = vector.broadcast %122 : f32 to vector<2x1xf32>
      %124 = arith.addf %121, %123 : vector<2x1xf32>
      %c0_59 = arith.constant 0 : index
      %c0_60 = arith.constant 0 : index
      %125 = vector.load %arg8[%c0_59, %c0_60] : memref<2x1xf32, #tpu.memory_space<vmem>>, vector<2x1xf32>
      tpu.vector_store %arg8[%c0_59, %c0_60], %124 {strides = array<i32>} : memref<2x1xf32, #tpu.memory_space<vmem>>, vector<2x1xf32>,
    } else {
    }
    return
  }
  func.func @transform_0(%arg0: i32, %arg1: i32, %arg2: i32) -> (i32, i32) {
    %c0_i32 = arith.constant 0 : i32
    %c0_i32_0 = arith.constant 0 : i32
    return %arg0, %c0_i32 : i32, i32
  }
  func.func @transform_1(%arg0: i32, %arg1: i32, %arg2: i32) -> (i32, i32, i32, i32) {
    %c0_i32 = arith.constant 0 : i32
    %c0_i32_0 = arith.constant 0 : i32
    return %arg1, %arg0, %arg2, %c0_i32 : i32, i32, i32, i32
  }
  func.func @transform_2(%arg0: i32, %arg1: i32, %arg2: i32) -> (i32, i32, i32) {
    %c0_i32 = arith.constant 0 : i32
    return %arg1, %arg0, %arg2 : i32, i32, i32
  }
  func.func @transform_3(%arg0: i32, %arg1: i32, %arg2: i32) -> i32 {
    %c0_i32 = arith.constant 0 : i32
    %c0_i32_0 = arith.constant 0 : i32
    return %c0_i32 : i32
  }
  func.func @transform_4(%arg0: i32, %arg1: i32, %arg2: i32) -> i32 {
    %c0_i32 = arith.constant 0 : i32
    %c0_i32_0 = arith.constant 0 : i32
    return %c0_i32 : i32
  }
  func.func @transform_5(%arg0: i32, %arg1: i32, %arg2: i32) -> (i32, i32) {
    %c0_i32 = arith.constant 0 : i32
    %c0_i32_0 = arith.constant 0 : i32
    return %arg0, %c0_i32 : i32, i32
  }
}

</mosaic_0001>

<bundles_post_ra>
// kernel: tpu_custom_call.1
= control target key start
LH: loop header
LB: loop body
LE: loop exit
PB: predicated region body
PF: predicated region fallthrough
CT: control target
= control target key end

     0   :  { %s1297_s0 = inlined_call_operand.vmem [shape: f32[2,1], index: 0, kind: input, shape index: {}]   ;;  %s1298_s1 = inlined_call_operand.hbm [shape: f32[4,2,8,32], index: 1, kind: input, shape index: {}]   ;;  %s1299_s2 = inlined_call_operand.hbm [shape: s32[4,2,8], index: 2, kind: input, shape index: {}]   ;;  %s1300_s3 = inlined_call_operand.vmem [shape: f32[3], index: 3, kind: input, shape index: {}]   ;;  %s1301_s4 = inlined_call_operand.<no memory space> [shape: f32[1], index: 4, kind: input, shape index: {}]   ;;  %s1302_s5 = inlined_call_operand.vmem [shape: f32[2,1], index: 5, kind: output, shape index: {}]  }
   0x1   :  { %1303 = sst [smem:[#allocation14_spill]] %s1298_s1 }
   0x2   :  { %10 = sst [smem:[#allocation4]] %s1301_s4 }
   0x3   :  { %11 = vsyncpa [#allocation6], 0 }
   0x4   :  { %13 = vsyncpa [#allocation6 + $0x1], 0 }
   0x5   :  { %14 = vsyncpa [#allocation9], 0 }
   0x6   :  { %16 = vsyncpa [#allocation9 + $0x1], 0 }
   0x7   :  { %17 = vsyncpa [#allocation7], 0  ;;  %s1097_s20 = smov 0   ;;  %s1099_s21 = smov 0  }
   0x8   :  { %s1101_s22 = smov 0   ;;  %s1103_s23 = smov 0  }
   0x9   :  { %s1105_s24 = smov 0   ;;  %s1107_s25 = smov 0  }
   0xa LB: > { %s797_s4 = sadd.s32 4294967295, %s1057_s25   ;;  %s79_s26 = sadd.s32 1, %s1045_s22  ;;  %s1057_s25 = sphi %s1107_s25, %s23_s25   ;;  %s1053_s24 = sphi %s1105_s24, %s1323_s24   ;;  %s1049_s23 = sphi %s1103_s23, %s1322_s23   ;;  %s1045_s22 = sphi %s1101_s22, %s1321_s22   ;;  %s1041_s21 = sphi %s1099_s21, %s1320_s21   ;;  %s1037_s20 = sphi %s1097_s20, %s1319_s20  }
   0xb   : > { %p86_p0 = scmp.ne.s32.totalorder %s1045_s22, %s1041_s21  ;;  %p87_p1 = scmp.eq.s32.totalorder %s1057_s25, 0 }
   0xc   : > { %p92_p2 = scmp.ne.s32.totalorder %s1041_s21, %s1037_s20  ;;  %p1131_p3 = scmp.eq.s32.totalorder %s797_s4, 0 }
   0xd   : > { %p88_p4 = por %p87_p1, %p86_p0  ;;  %p798_p5 = scmp.ge.s32.totalorder %s1057_s25, 1 }
   0xe   : > { %p1138_p6 = por %p1131_p3, %p92_p2  ;;  %p201_p7 = scmp.lt.s32.totalorder %s1057_s25, 5 }
   0xf   : > { %s220_s6 = sshll.u32 %s1300_s3, 4  ;;  %p842_p10 = scmp.lt.s32.totalorder %s1057_s25, 4  ;;  %s221_s6 = int_to_ptr.vmem [resolvable:$true] %s220_s6 }
  0x10   : > { %p1146_p8 = pnand %p798_p5, %p201_p7  ;;  %s1154_s8 = sand.u32 1, %s1045_s22  }
  0x11   : > { %p1158_p12 = pnand %p842_p10, %p88_p4  ;;  %s1059_s10 = smov [#allocation10]  }
  0x12   : > { %p830_p9 = pneg %p1146_p8  ;;  %s38_s11 = sadd.s32 1, %s1053_s24 }
  0x13   : > { %s802_s12 = sshll.u32 %s1154_s8, 4  ;;  %p40_p13 = scmp.ge.s32.totalorder %s38_s11, 4 }
  0x14   : > { %p831_p11 = pnand %p830_p9, %p1131_p3  ;;  %s820_s13 = sshll.u32 %s1053_s24, 4 }
  0x15   : > { %s238_s14 = scalar_lea.vmem [#allocation5], %s802_s12  ;;  %s1325_s11 = smov (%p40_p13, %s38_s11), 0 }
  0x16   : > { %833 = dma.vmem_to_smem (!%p831_p11), %s221_s6, 16, %s1059_s10, [#allocation7]  }
  0x17   : > { %s249_s15 = sshll.u32 %s238_s14, 4  ;;  %s1308_s1 = sld [smem:[#allocation14_spill]]  ;;  %s250_s15 = int_to_ptr.vmem [resolvable:$true] %s249_s15 }
  0x18   : > { %s72_s19 = ssub.s32 %s1053_s24, %s1325_s11  ;;  %s235_s29 = scalar_lea.sflag [#allocation6], %s1154_s8 }
  0x19   : > { %p77_p0 = scmp.eq.s32.totalorder %s72_s19, 0  ;;  %s1060_s30 = smov 128  }
  0x1a   : > { %s1061_s6 = smov 8   ;;  %s805_s10 = sshll.u32 %s1154_s8, 1 }
  0x1b   : > { %s1175_s4 = scalar_select %p77_p0, %s1045_s22, %s79_s26  }
  0x1c   : > { %s806_s12 = sshll.u32 %s1053_s24, 1  ;;  %s263_s17 = scalar_lea.vmem [#allocation8], %s805_s10 }
  0x1d   : > { %s246_s18 = scalar_lea.hbm %s1308_s1, %s820_s13  ;;  %s269_s13 = scalar_lea.hbm %s1299_s2, %s806_s12 }
  0x1e   : > { %s247_s20 = sshll.u32 %s246_s18, 4  ;;  %s273_s18 = sshll.u32 %s263_s17, 4  ;;  %s248_s20 = int_to_ptr.hbm [resolvable:$true] %s247_s20  ;;  %s274_s18 = int_to_ptr.vmem [resolvable:$true] %s273_s18 }
  0x1f   : > { %837 = dma.hbm_to_vmem [thread:$0]  (!%p1158_p12), %s248_s20, 256, %s250_s15, %s235_s29, %s1060_s30, %s1060_s30, %s1061_s6  }
  0x20   : > { %s271_s1 = sshll.u32 %s269_s13, 4  ;;  %s260_s19 = scalar_lea.sflag [#allocation9], %s1154_s8  ;;  %s272_s1 = int_to_ptr.hbm [resolvable:$true] %s271_s1 }
  0x21   : > { %840 = dma.hbm_to_vmem [thread:$0]  (!%p1158_p12), %s272_s1, 32, %s274_s18, %s260_s19  }
  0x22   : > { %282 = sbr.rel (%p1146_p8) target bundleno = 494 (0x1ee), region = 40  ;;  %s284_s26 = sand.u32 (!%p1146_p8), 1, %s1041_s21  }
  0x23   : > { %s808_s15 = sshll.u32 (!%p1146_p8), %s284_s26, 4  ;;  %s285_s20 = scalar_lea.sflag (!%p1146_p8), [#allocation6], %s284_s26 }
  0x24   : > { %s1191_s29 = scalar_lea.vmem (!%p1146_p8), [#allocation5], %s808_s15 }
  0x27   : > { %1024 = dma.done.wait (%p1138_p6), %s285_s20, 256  }
  0x28   : > { %1026 = vsyncadd (%p1138_p6), %s285_s20, 4294967040  ;;  %s809_s30 = sshll.u32 %s284_s26, 1  ;;  %s295_s8 = scalar_lea.sflag [#allocation9], %s284_s26 }
  0x29   : > { %s298_s9 = scalar_lea.vmem [#allocation8], %s809_s30 }
  0x2a   : > { %1028 = dma.done.wait (%p1138_p6), %s295_s8, 32  }
  0x2b   : > { %1030 = vsyncadd (%p1138_p6), %s295_s8, 4294967264 }
  0x2c   : > { %1032 = dma.done.wait (%p1131_p3), [#allocation7], 16  }
  0x2d   : > { %1034 = vsyncadd (%p1131_p3), [#allocation7], 4294967280 }
  0x2e   : > { %309 = sfence }
  0x2f   : > { %v354_v0 = vlaneseq  ;;  %v351_v1 = vld [vmem:[%s298_s9] sm:$0x3]  ;;  %vm384_vm0 = vcmask 58368   ;;  %p415_p1 = scmp.eq.s32.totalorder %s1049_s23, 3  ;;  %s811_s1 = sshll.u32 %s1049_s23, 1  ;;  %vm394_vm1 = vcmask 254976  }
  0x30   : > { %v352_v2 = vcvt.s32.f32 %v351_v1  ;;  %vm397_vm2 = vcmask 1024   ;;  %s1207_s27 = scalar_lea.vmem [#allocation2], %s811_s1  ;;  %v1062_v7 = vmov 0.0   ;;  %s396_s28 = scalar_lea.vmem [#allocation3], %s811_s1  ;;  %v349_v11 = vld [vmem:[%s1191_s29] sm:$0xff]  ;;  %vm369_vm3 = vcmask 261120  }
  0x31   : > { %v355_v3 = vshrl.u32 %v354_v0, 7  ;;  %395 = vst.msk [vmem:[%s1207_s27] sm:$0x3] %vm394_vm1, %v1062_v7  ;;  %v350_v17 = vld [vmem:[%s1191_s29 + $0x8] sm:$0xff]  ;;  %vm404_vm4 = vcmask 1041409   ;;  %v1063_v36 = vmov (%p415_p1), 0  }
  0x32   : > { %v385_v4 = vsel %vm384_vm0, %v352_v2, 0.0  ;;  %v353_v5 = vperm.slane %v352_v2, 0  ;;  %v360_v6 = vperm.slane %v352_v2, 1  ;;  %398 = vst.msk [vmem:[%s396_s28] sm:$0x3] %vm397_vm2, %v1062_v7  ;;  %899 = vset.pattern.permute.xlu1 (%p415_p1), %v1063_v36  ;;  %s1267_s6 = sld [smem:[#allocation10]] (%p415_p1) }
  0x33   : > { %897 = vset.pattern.permute.xlu0 %v355_v3  ;;  %386 = vadd.xlane.f32.xlu1 %v385_v4  ;;  %s1271_s10 = sld [smem:[#allocation10 + $0x1]] (%p415_p1) }
  0x34   : > { %s816_s12 = sld [smem:[#allocation10 + $0x2]] (%p415_p1) }
  0x35   : > { %s656_s14 = sld [smem:[#allocation4]] (%p415_p1) }
  0x38   : > { %v401_v31 = vld [vmem:[%s1207_s27] sm:$0x3] }
  0x39   : > { %v411_v8 = vld [vmem:[%s396_s28] sm:$0x3] }
  0x3b   : > { %358 = vperm.xlu0 %897, %v353_v5  }
  0x43   : > { %365 = vperm.xlu0 %897, %v360_v6  }
  0x4b   : > { %898 = vset.pattern.permute.xlu0 (%p415_p1), %v1063_v36 }
  0xa6   : > { %v387_v9 = vpop.xlane.xlu1 %386 }
  0xa7   : > { %v412_v10 = vadd.f32 %v411_v8, %v387_v9 }
  0xa9   : > { %414 = vst.msk [vmem:[%s396_s28] sm:$0x3] %vm397_vm2, %v412_v10 }
  0xad   : > { %v359_v12 = vpop.permute.xlu0 %358 }
  0xae   : > { %v367_v13 = vmul.f32 %v359_v12, %v349_v11 }
  0xb0   : > { %v370_v14 = vsel %vm369_vm3, %v367_v13, 0.0  ;;  %v469_v34 = vld [vmem:[#allocation3 + $0x4] sm:$0x3] (%p415_p1)  ;;  %v421_v35 = vld [vmem:[#allocation3] sm:$0x3] (%p415_p1) }
  0xb1   : > { %v371_v15 = vrot.slane %v370_v14, 4  ;;  %900 = vrcp.f32 (%p415_p1), %v469_v34  ;;  %v493_v37 = vld [vmem:[#allocation3 + $0x6] sm:$0x3] (%p415_p1)  ;;  %v445_v38 = vld [vmem:[#allocation3 + $0x2] sm:$0x3] (%p415_p1)  ;;  %v481_v41 = vand.u32 (%p415_p1), 2147483648, %v469_v34  ;;  %vm475_vm5 = vweird.f32 (%p415_p1), %v469_v34 }
  0xb2   : > { %902 = vrcp.f32 (%p415_p1), %v421_v35  ;;  %v479_v40 = vand.u32 (%p415_p1), 2147483647, %v469_v34  ;;  %v431_v46 = vand.u32 (%p415_p1), 2147483647, %v421_v35  ;;  %v433_v47 = vand.u32 (%p415_p1), 2147483648, %v421_v35 }
  0xb3   : > { %v372_v16 = vadd.f32 %v371_v15, %v370_v14  ;;  %904 = vrcp.f32 (%p415_p1), %v493_v37  ;;  %vm427_vm7 = vweird.f32 (%p415_p1), %v421_v35  ;;  %v482_v52 = vor.u32 (%p415_p1), 1.1754944e-38, %v481_v41 }
  0xb4   : > { %906 = vrcp.f32 (%p415_p1), %v445_v38  ;;  %vm1220_vm8 = vcmp.eq.f32.partialorder (%p415_p1), %v479_v40, 8.507059e+37  ;;  %vm499_vm10 = vweird.f32 (%p415_p1), %v493_v37  ;;  %vm1229_vm12 = vcmp.eq.f32.partialorder (%p415_p1), %v431_v46, 8.507059e+37 }
  0xb5   : > { %v366_v18 = vpop.permute.xlu0 %365  ;;  %v373_v20 = vrot.slane %v372_v16, 2  ;;  %v434_v60 = vor.u32 (%p415_p1), 1.1754944e-38, %v433_v47  ;;  %v503_v61 = vand.u32 (%p415_p1), 2147483647, %v493_v37  ;;  %v505_v3 = vand.u32 (%p415_p1), 2147483648, %v493_v37 }
  0xb6   : > { %v368_v19 = vmul.f32 %v366_v18, %v350_v17  ;;  %vm451_vm15 = vweird.f32 (%p415_p1), %v445_v38  ;;  %v457_v7 = vand.u32 (%p415_p1), 2147483648, %v445_v38  ;;  %v455_v10 = vand.u32 (%p415_p1), 2147483647, %v445_v38 }
  0xb7   : > { %v374_v23 = vadd.f32 %v373_v20, %v372_v16  ;;  %v901_v39 = vpop.eup (%p415_p1), %900  ;;  %v506_v13 = vor.u32 (%p415_p1), 1.1754944e-38, %v505_v3 }
  0xb8   : > { %v377_v21 = vsel %vm369_vm3, %v368_v19, 0.0  ;;  %v903_v42 = vpop.eup (%p415_p1), %902  ;;  %v471_v43 = vmul.f32 (%p415_p1), %v901_v39, %v469_v34  ;;  %vm476_vm6 = vweird.f32 (%p415_p1), %v901_v39  ;;  %v458_v15 = vor.u32 (%p415_p1), 1.1754944e-38, %v457_v7 }
  0xb9   : > { %v378_v22 = vrot.slane %v377_v21, 4  ;;  %v375_v26 = vrot.slane %v374_v23, 1  ;;  %v905_v44 = vpop.eup (%p415_p1), %904  ;;  %v423_v45 = vmul.f32 (%p415_p1), %v903_v42, %v421_v35  ;;  %vm428_vm9 = vweird.f32 (%p415_p1), %v903_v42  ;;  %vm1225_vm11 = vmor (%p415_p1), %vm475_vm5, %vm476_vm6 }
  0xba   : > { %v472_v48 = vsub.f32 (%p415_p1), 1.0, %v471_v43  ;;  %v495_v49 = vmul.f32 (%p415_p1), %v905_v44, %v493_v37  ;;  %v907_v50 = vpop.eup (%p415_p1), %906  ;;  %vm1234_vm13 = vmor (%p415_p1), %vm427_vm7, %vm428_vm9  ;;  %vm500_vm14 = vweird.f32 (%p415_p1), %v905_v44  ;;  %vm504_vm5 = vcmp.eq.f32.partialorder (%p415_p1), %v503_v61, 8.507059e+37  ;;  %v514_v43 = vld [vmem:[%s1297_s0] sm:$0x3] (%p415_p1) }
  0xbb   : > { %v379_v24 = vadd.f32 %v378_v22, %v377_v21  ;;  %v376_v29 = vadd.f32 %v375_v26, %v374_v23  ;;  %v424_v53 = vsub.f32 (%p415_p1), 1.0, %v423_v45  ;;  %v447_v56 = vmul.f32 (%p415_p1), %v907_v50, %v445_v38  ;;  %vm501_vm3 = vmor (%p415_p1), %vm499_vm10, %vm500_vm14 }
  0xbc   : > { %v473_v54 = vmul.f32 (%p415_p1), %v901_v39, %v472_v48  ;;  %v496_v55 = vsub.f32 (%p415_p1), 1.0, %v495_v49  ;;  %vm452_vm0 = vweird.f32 (%p415_p1), %v907_v50  ;;  %vm456_vm6 = vcmp.eq.f32.partialorder (%p415_p1), %v455_v10, 8.507059e+37 }
  0xbd   : > { %v380_v25 = vrot.slane %v379_v24, 2  ;;  %v425_v58 = vmul.f32 (%p415_p1), %v903_v42, %v424_v53  ;;  %v448_v1 = vsub.f32 (%p415_p1), 1.0, %v447_v56  ;;  %v814_v46 = vmul.f32 (%p415_p1), -1.442695, %v514_v43 }
  0xbe   : > { %v474_v62 = vadd.f32 (%p415_p1), %v901_v39, %v473_v54  ;;  %v497_v0 = vmul.f32 (%p415_p1), %v905_v44, %v496_v55 }
  0xbf   : > { %v381_v27 = vadd.f32 %v380_v25, %v379_v24  ;;  %v426_v2 = vadd.f32 (%p415_p1), %v903_v42, %v425_v58  ;;  %v449_v6 = vmul.f32 (%p415_p1), %v907_v50, %v448_v1 }
  0xc0   : > { %v478_v4 = vsel (%p415_p1), %vm1225_vm11, %v901_v39, %v474_v62  ;;  %v498_v5 = vadd.f32 (%p415_p1), %v905_v44, %v497_v0 }
  0xc1   : > { %v382_v28 = vrot.slane %v381_v27, 1  ;;  %v483_v8 = vsel (%p415_p1), %vm1220_vm8, %v482_v52, %v478_v4  ;;  %v430_v9 = vsel (%p415_p1), %vm1234_vm13, %v903_v42, %v426_v2  ;;  %v450_v12 = vadd.f32 (%p415_p1), %v907_v50, %v449_v6 }
  0xc2   : > { %486 = vperm.xlu1 (%p415_p1), %899, %v483_v8   ;;  %v435_v11 = vsel (%p415_p1), %vm1229_vm12, %v434_v60, %v430_v9  ;;  %v502_v14 = vsel (%p415_p1), %vm501_vm3, %v905_v44, %v498_v5 }
  0xc3   : > { %v383_v30 = vadd.f32 %v382_v28, %v381_v27  ;;  %438 = vperm.xlu0 (%p415_p1), %898, %v435_v11   ;;  %v507_v17 = vsel (%p415_p1), %vm504_vm5, %v506_v13, %v502_v14 }
  0xc4   : > { %419 = sbr.rel (!%p415_p1) target bundleno = 494 (0x1ee), region = 60 }
  0xc5   : > { %v405_v32 = vsel %vm404_vm4, %v383_v30, %v376_v29  ;;  %vm453_vm4 = vmor (%p415_p1), %vm451_vm15, %vm452_vm0 }
  0xc6   : > { %v407_v33 = vadd.f32 %v405_v32, %v401_v31  ;;  %v454_v16 = vsel (%p415_p1), %vm453_vm4, %v907_v50, %v450_v12 }
  0xc7   : > { %v459_v18 = vsel (%p415_p1), %vm456_vm6, %v458_v15, %v454_v16 }
  0xc8   : > { %409 = vst.msk [vmem:[%s1207_s27] sm:$0x3] %vm394_vm1, %v407_v33 }
  0xca   : > { %510 = vperm.xlu1 %899, %v507_v17  }
  0xcb   : > { %462 = vperm.xlu0 %898, %v459_v18  }
  0xcf   : > { %v467_v19 = vld [vmem:[#allocation2 + $0x4] sm:$0x3]  ;;  %v420_v20 = vld [vmem:[#allocation2] sm:$0x3]  ;;  %v491_v29 = vld [vmem:[#allocation2 + $0x6] sm:$0x3] }
  0xd0   : > { %v443_v30 = vld [vmem:[#allocation2 + $0x2] sm:$0x3] }
 0x134   : > { %v487_v21 = vpop.permute.xlu1 %486 }
 0x135   : > { %v489_v22 = vmul.f32 %v487_v21, %v467_v19  ;;  %v439_v23 = vpop.permute.xlu0 %438 }
 0x136   : > { %v441_v24 = vmul.f32 %v439_v23, %v420_v20 }
 0x137   : > { %v592_v25 = vmul.f32 %v489_v22, %v489_v22 }
 0x138   : > { %v538_v26 = vmul.f32 %v441_v24, %v441_v24 }
 0x139   : > { %v593_v27 = vsel %vm394_vm1, %v592_v25, 0.0 }
 0x13a   : > { %594 = vadd.xlane.f32.xlu0 %v593_v27  ;;  %v539_v28 = vsel %vm394_vm1, %v538_v26, 0.0 }
 0x13b   : > { %540 = vadd.xlane.f32.xlu2 %v539_v28 }
 0x13c   : > { %v511_v31 = vpop.permute.xlu1 %510 }
 0x13d   : > { %v513_v32 = vmul.f32 %v511_v31, %v491_v29  ;;  %v463_v33 = vpop.permute.xlu0 %462 }
 0x13e   : > { %v465_v34 = vmul.f32 %v463_v33, %v443_v30 }
 0x13f   : > { %v608_v35 = vmul.f32 %v513_v32, %v513_v32  ;;  %v588_v41 = vmul.f32 %v513_v32, %v489_v22 }
 0x140   : > { %v554_v36 = vmul.f32 %v465_v34, %v465_v34  ;;  %v534_v39 = vmul.f32 %v465_v34, %v441_v24 }
 0x141   : > { %v609_v37 = vsel %vm394_vm1, %v608_v35, 0.0  ;;  %v589_v42 = vsel %vm394_vm1, %v588_v41, 0.0 }
 0x142   : > { %610 = vadd.xlane.f32.xlu1 %v609_v37  ;;  %v555_v38 = vsel %vm394_vm1, %v554_v36, 0.0  ;;  %v535_v40 = vsel %vm394_vm1, %v534_v39, 0.0 }
 0x143   : > { %556 = vadd.xlane.f32.xlu2 %v555_v38 }
 0x14b   : > { %536 = vadd.xlane.f32.xlu2 %v535_v40 }
 0x153   : > { %590 = vadd.xlane.f32.xlu2 %v589_v42 }
 0x1ad   : > { %v595_v44 = vpop.xlane.xlu0 %594 }
 0x1ae   : > { %908 = vrsqrt.f32 %v595_v44  ;;  %v541_v45 = vpop.xlane.xlu2 %540  ;;  %vm603_vm1 = vcmp.eq.f32.partialorder %v595_v44, inf  ;;  %vm605_vm7 = vcmp.eq.f32.partialorder %v595_v44, 0.0  ;;  %v606_v14 = vand.u32 2147483648, %v595_v44 }
 0x1af   : > { %910 = vrsqrt.f32 %v541_v45  ;;  %vm549_vm8 = vcmp.eq.f32.partialorder %v541_v45, inf  ;;  %vm551_vm9 = vcmp.eq.f32.partialorder %v541_v45, 0.0  ;;  %v552_v17 = vand.u32 2147483648, %v541_v45 }
 0x1b0   : > { %912 = vpow2.f32 %v814_v46 }
 0x1b4   : > { %v909_v47 = vpop.eup %908 }
 0x1b5   : > { %v911_v48 = vpop.eup %910  ;;  %v597_v49 = vmul.f32 %v909_v47, %v595_v44  ;;  %v611_v50 = vpop.xlane.xlu1 %610 }
 0x1b6   : > { %v543_v51 = vmul.f32 %v911_v48, %v541_v45  ;;  %914 = vrsqrt.f32 %v611_v50  ;;  %v557_v52 = vpop.xlane.xlu2 %556  ;;  %v913_v55 = vpop.eup %912  ;;  %vm619_vm10 = vcmp.eq.f32.partialorder %v611_v50, inf  ;;  %vm621_vm11 = vcmp.eq.f32.partialorder %v611_v50, 0.0 }
 0x1b7   : > { %v598_v53 = vmul.f32 %v909_v47, %v597_v49  ;;  %916 = vrsqrt.f32 %v557_v52  ;;  %v1256_v61 = vadd.f32 1.0, %v913_v55  ;;  %v622_v20 = vand.u32 2147483648, %v611_v50 }
 0x1b8   : > { %v544_v54 = vmul.f32 %v911_v48, %v543_v51  ;;  %vm565_vm12 = vcmp.eq.f32.partialorder %v557_v52, inf  ;;  %v568_v24 = vand.u32 2147483648, %v557_v52  ;;  %vm567_vm13 = vcmp.eq.f32.partialorder %v557_v52, 0.0 }
 0x1b9   : > { %v599_v56 = vmul.f32 0.5, %v598_v53  ;;  %918 = vrcp.f32 %v1256_v61  ;;  %vm524_vm14 = vweird.f32 %v1256_v61  ;;  %v530_v37 = vand.u32 2147483648, %v1256_v61 }
 0x1ba   : > { %v545_v57 = vmul.f32 0.5, %v544_v54  ;;  %v528_v40 = vand.u32 2147483647, %v1256_v61 }
 0x1bb   : > { %v600_v58 = vsub.f32 1.5, %v599_v56  ;;  %v531_v46 = vor.u32 1.1754944e-38, %v530_v37 }
 0x1bc   : > { %v915_v59 = vpop.eup %914  ;;  %v546_v60 = vsub.f32 1.5, %v545_v57  ;;  %vm529_vm3 = vcmp.eq.f32.partialorder %v528_v40, 8.507059e+37 }
 0x1bd   : > { %v917_v62 = vpop.eup %916  ;;  %v601_v63 = vmul.f32 %v909_v47, %v600_v58  ;;  %v613_v0 = vmul.f32 %v915_v59, %v611_v50 }
 0x1be   : > { %v547_v1 = vmul.f32 %v911_v48, %v546_v60  ;;  %v559_v2 = vmul.f32 %v917_v62, %v557_v52  ;;  %v537_v41 = vpop.xlane.xlu2 %536 }
 0x1bf   : > { %v614_v3 = vmul.f32 %v915_v59, %v613_v0  ;;  %v602_v5 = vmul.f32 %v601_v63, %v595_v44  ;;  %v919_v13 = vpop.eup %918 }
 0x1c0   : > { %v560_v4 = vmul.f32 %v917_v62, %v559_v2  ;;  %v548_v7 = vmul.f32 %v547_v1, %v541_v45  ;;  %v520_v25 = vmul.f32 %v919_v13, %v1256_v61  ;;  %vm525_vm15 = vweird.f32 %v919_v13 }
 0x1c1   : > { %v615_v6 = vmul.f32 0.5, %v614_v3  ;;  %v604_v11 = vsel %vm603_vm1, %v595_v44, %v602_v5  ;;  %vm1263_vm0 = vmor %vm524_vm14, %vm525_vm15  ;;  %v646_v3 = vstv %s1267_s6 }
 0x1c2   : > { %v561_v8 = vmul.f32 0.5, %v560_v4  ;;  %v550_v15 = vsel %vm549_vm8, %v541_v45, %v548_v7  ;;  %v607_v19 = vsel %vm605_vm7, %v606_v14, %v604_v11  ;;  %v521_v34 = vsub.f32 1.0, %v520_v25 }
 0x1c3   : > { %v616_v9 = vsub.f32 1.5, %v615_v6  ;;  %v553_v22 = vsel %vm551_vm9, %v552_v17, %v550_v15  ;;  %v624_v28 = vmax.f32 %v607_v19, 1e-08  ;;  %v649_v6 = vstv %s1271_s10 }
 0x1c4   : > { %v562_v10 = vsub.f32 1.5, %v561_v8  ;;  %v570_v31 = vmax.f32 %v553_v22, 1e-08  ;;  %v522_v36 = vmul.f32 %v919_v13, %v521_v34  ;;  %v657_v14 = vstv %s656_s14 }
 0x1c5   : > { %v617_v12 = vmul.f32 %v915_v59, %v616_v9 }
 0x1c6   : > { %v563_v16 = vmul.f32 %v917_v62, %v562_v10  ;;  %v523_v39 = vadd.f32 %v919_v13, %v522_v36  ;;  %v591_v1 = vpop.xlane.xlu2 %590  ;;  %v653_v10 = vstv %s816_s12 }
 0x1c7   : > { %v618_v18 = vmul.f32 %v617_v12, %v611_v50 }
 0x1c8   : > { %v564_v21 = vmul.f32 %v563_v16, %v557_v52  ;;  %v527_v48 = vsel %vm1263_vm0, %v919_v13, %v523_v39 }
 0x1c9   : > { %v620_v23 = vsel %vm619_vm10, %v611_v50, %v618_v18  ;;  %v532_v56 = vsel %vm529_vm3, %v531_v46, %v527_v48 }
 0x1ca   : > { %v623_v26 = vsel %vm621_vm11, %v622_v20, %v620_v23  ;;  %v566_v27 = vsel %vm565_vm12, %v557_v52, %v564_v21  ;;  %v642_v63 = vmax.f32 %v532_v56, 0.0 }
 0x1cb   : > { %v625_v29 = vmax.f32 %v623_v26, 1e-08  ;;  %v569_v30 = vsel %vm567_vm13, %v568_v24, %v566_v27 }
 0x1cc   : > { %v571_v32 = vmax.f32 %v569_v30, 1e-08  ;;  %v647_v7 = vmul.f32 %v646_v3, %v642_v63 }
 0x1cd   : > { %v626_v33 = vmul.f32 %v625_v29, %v624_v28 }
 0x1ce   : > { %v572_v35 = vmul.f32 %v571_v32, %v570_v31 }
 0x1cf   : > { %920 = vrcp.f32 %v626_v33  ;;  %v638_v50 = vand.u32 2147483648, %v626_v33  ;;  %v636_v53 = vand.u32 2147483647, %v626_v33  ;;  %vm632_vm6 = vweird.f32 %v626_v33 }
 0x1d0   : > { %922 = vrcp.f32 %v572_v35  ;;  %v584_v51 = vand.u32 2147483648, %v572_v35  ;;  %v582_v55 = vand.u32 2147483647, %v572_v35  ;;  %vm578_vm1 = vweird.f32 %v572_v35 }
 0x1d1   : > { %v639_v59 = vor.u32 1.1754944e-38, %v638_v50  ;;  %vm637_vm9 = vcmp.eq.f32.partialorder %v636_v53, 8.507059e+37 }
 0x1d2   : > { %v585_v60 = vor.u32 1.1754944e-38, %v584_v51  ;;  %vm583_vm10 = vcmp.eq.f32.partialorder %v582_v55, 8.507059e+37 }
 0x1d5   : > { %v921_v38 = vpop.eup %920 }
 0x1d6   : > { %v923_v42 = vpop.eup %922  ;;  %v628_v44 = vmul.f32 %v921_v38, %v626_v33  ;;  %vm633_vm4 = vweird.f32 %v921_v38 }
 0x1d7   : > { %v574_v45 = vmul.f32 %v923_v42, %v572_v35  ;;  %vm579_vm5 = vweird.f32 %v923_v42  ;;  %vm634_vm7 = vmor %vm632_vm6, %vm633_vm4 }
 0x1d8   : > { %v629_v47 = vsub.f32 1.0, %v628_v44  ;;  %vm580_vm8 = vmor %vm578_vm1, %vm579_vm5 }
 0x1d9   : > { %v575_v49 = vsub.f32 1.0, %v574_v45 }
 0x1da   : > { %v630_v52 = vmul.f32 %v921_v38, %v629_v47 }
 0x1db   : > { %v576_v54 = vmul.f32 %v923_v42, %v575_v49 }
 0x1dc   : > { %v631_v57 = vadd.f32 %v921_v38, %v630_v52 }
 0x1dd   : > { %v577_v58 = vadd.f32 %v923_v42, %v576_v54 }
 0x1de   : > { %v635_v61 = vsel %vm634_vm7, %v921_v38, %v631_v57 }
 0x1df   : > { %v581_v62 = vsel %vm580_vm8, %v923_v42, %v577_v58  ;;  %v640_v0 = vsel %vm637_vm9, %v639_v59, %v635_v61 }
 0x1e0   : > { %v586_v2 = vsel %vm583_vm10, %v585_v60, %v581_v62  ;;  %v641_v4 = vmul.f32 %v640_v0, %v591_v1 }
 0x1e1   : > { %v587_v5 = vmul.f32 %v586_v2, %v537_v41 }
 0x1e2   : > { %v644_v9 = vmax.f32 %v641_v4, 0.0 }
 0x1e3   : > { %v643_v8 = vmax.f32 %v587_v5, 0.0 }
 0x1e4   : > { %v654_v13 = vmul.f32 %v653_v10, %v644_v9 }
 0x1e5   : > { %v650_v11 = vmul.f32 %v649_v6, %v643_v8 }
 0x1e7   : > { %v651_v12 = vadd.f32 %v650_v11, %v647_v7 }
 0x1e9   : > { %v655_v15 = vadd.f32 %v654_v13, %v651_v12 }
 0x1eb   : > { %v658_v16 = vadd.f32 %v657_v14, %v655_v15 }
 0x1ed   : > { %659 = vst.msk [vmem:[%s1302_s5] sm:$0x3] %vm397_vm2, %v658_v16 }
 0x1ee PF: > { %s23_s25 = sadd.s32 1, %s1057_s25   ;;  %s1319_s20 = smov %s1041_s21 }
 0x1ef   : > { %p20_p2 = scmp.ge.s32.totalorder %s23_s25, 6   ;;  %s1320_s21 = smov %s1045_s22 }
 0x1f0   : > { %s1321_s22 = smov %s1175_s4  ;;  %s1322_s23 = smov %s1053_s24 }
 0x1f1   : > { %s1323_s24 = smov %s1325_s11  ;;  %22 = sbr.rel (!%p20_p2) target bundleno = 10 (0xa), region = 119 }
 0x1f6   :  { %679 = vsyncpa [#allocation6], 1 }
 0x1f7   :  { %681 = vsyncpa [#allocation6 + $0x1], 1 }
 0x1f8   :  { %682 = vsyncpa [#allocation9], 1 }
 0x1f9   :  { %684 = vsyncpa [#allocation9 + $0x1], 1 }
 0x1fa   :  { %685 = vsyncpa [#allocation7], 1 }
 0x1fb   :  { %687 = vsyncpa [#allocation7 + $0x1], 1 }

</bundles_post_ra>
